<compile_context>
chip_gen: v7x
topology: tpu7x:2x2x1
jax: 0.10.0
libtpu: 0.0.40
codegen_flags: <defaults>
</compile_context>

<pallas_src>
import functools

import jax
import jax.numpy as jnp
from jax.experimental import pallas as pl
from jax.experimental.pallas import tpu as pltpu


def _round_up(v: int, m: int) -> int:
    return (v + m - 1) // m * m


def _predictor_kernel(x_ref, w1_ref, b1_ref, w2_ref, b2_ref, out_ref):
    # Layer 1 (fused cls + bbox): (tile_n, Cp) @ (Cp, Hp) + (1, Hp)
    h = jnp.dot(x_ref[...], w1_ref[...],
                preferred_element_type=jnp.float32) + b1_ref[...]
    # Layer 2 (block-diagonal cls/bbox): (tile_n, Hp) @ (Hp, Op) + (1, Op)
    out = jnp.dot(h.astype(w2_ref.dtype), w2_ref[...],
                  preferred_element_type=jnp.float32) + b2_ref[...]
    out_ref[...] = out.astype(out_ref.dtype)


@functools.partial(jax.jit, static_argnames=("tile_n", "compute_dtype"))
def two_layered_fast_rcnn_predictor(x, params, *, tile_n=128,
                                    compute_dtype=jnp.float32):
    """x: (N, C) or (N, C, 1, 1). Returns (scores (N, K2), bbox_deltas (N, 4*K2))."""
    if x.ndim == 4:
        assert x.shape[2] == 1 and x.shape[3] == 1, (
            f"x has the wrong shape, expecting the last two dimensions to be "
            f"[1,1] instead of {list(x.shape[2:])}")
    x2d = x.reshape(x.shape[0], -1)

    wc1, bc1, wb1, bb1, wc2, bc2, wb2, bb2 = params
    N, C = x2d.shape
    k1 = wc1.shape[1]
    k2 = wc2.shape[1]
    H = k1 + 4 * k1            # fused layer-1 output width
    O = k2 + 4 * k2            # fused layer-2 output width: [scores | bbox]

    # ---- pad everything to (8, 128)-aligned, lane-dense shapes -------------
    Cp = _round_up(C, 128)
    Hp = _round_up(H, 128)
    Op = _round_up(O, 128)
    tile_n = min(tile_n, _round_up(N, 8))
    Np = _round_up(N, tile_n)

    # Fused layer-1 weight/bias: cols [0:k1] = cls_score_1, [k1:H] = bbox_pred_1.
    w1 = jnp.zeros((Cp, Hp), jnp.float32)
    w1 = w1.at[:C, :k1].set(wc1).at[:C, k1:H].set(wb1)
    b1 = jnp.zeros((1, Hp), jnp.float32)
    b1 = b1.at[0, :k1].set(bc1).at[0, k1:H].set(bb1)

    # Block-diagonal layer-2 weight/bias: cls block top-left, bbox bottom-right.
    w2 = jnp.zeros((Hp, Op), jnp.float32)
    w2 = w2.at[:k1, :k2].set(wc2).at[k1:H, k2:O].set(wb2)
    b2 = jnp.zeros((1, Op), jnp.float32)
    b2 = b2.at[0, :k2].set(bc2).at[0, k2:O].set(bb2)

    x_pad = jnp.zeros((Np, Cp), jnp.float32).at[:N, :C].set(x2d)

    # Optional bf16 matmul inputs for v6e/v7x MXU throughput (f32 accumulation
    # is kept inside the kernel; biases stay f32).
    if compute_dtype != jnp.float32:
        x_pad = x_pad.astype(compute_dtype)
        w1 = w1.astype(compute_dtype)
        w2 = w2.astype(compute_dtype)

    grid = (Np // tile_n,)
    out = pl.pallas_call(
        _predictor_kernel,
        out_shape=jax.ShapeDtypeStruct((Np, Op), jnp.float32),
        grid_spec=pltpu.PrefetchScalarGridSpec(
            num_scalar_prefetch=0,
            grid=grid,
            in_specs=[
                pl.BlockSpec((tile_n, Cp), lambda i: (i, 0)),   # x row tile
                pl.BlockSpec((Cp, Hp), lambda i: (0, 0)),       # W1 (resident)
                pl.BlockSpec((1, Hp), lambda i: (0, 0)),        # b1 (resident)
                pl.BlockSpec((Hp, Op), lambda i: (0, 0)),       # W2 (resident)
                pl.BlockSpec((1, Op), lambda i: (0, 0)),        # b2 (resident)
            ],
            out_specs=pl.BlockSpec((tile_n, Op), lambda i: (i, 0)),
        ),
        compiler_params=pltpu.CompilerParams(
            # N-tiles are independent -> megacore shards them on v7x.
            dimension_semantics=("parallel",),
            # Tiny footprint here; for production Fast-RCNN sizes, re-derive
            # tile_n against v7x's 64 MiB VMEM (vs 128 MiB on v5e/v6e) and
            # raise vmem_limit_bytes if needed.
        ),
    )(x_pad, w1, b1, w2, b2)

    scores = out[:N, :k2]
    bbox_deltas = out[:N, k2:O]
    return scores, bbox_deltas


def init_params(key, in_channels, num_classes_1, num_classes_2):
    """Matches the torch __init__ scheme; weights stored transposed as (in, out)."""
    k1, k2, k3, k4 = jax.random.split(key, 4)
    wc1 = 0.01 * jax.random.normal(k1, (in_channels, num_classes_1), jnp.float32)
    bc1 = jnp.zeros((num_classes_1,), jnp.float32)
    wb1 = 0.001 * jax.random.normal(k2, (in_channels, num_classes_1 * 4), jnp.float32)
    bb1 = jnp.zeros((num_classes_1 * 4,), jnp.float32)
    wc2 = 0.01 * jax.random.normal(k3, (num_classes_1, num_classes_2), jnp.float32)
    bc2 = jnp.zeros((num_classes_2,), jnp.float32)
    wb2 = 0.001 * jax.random.normal(k4, (num_classes_1 * 4, num_classes_2 * 4), jnp.float32)
    bb2 = jnp.zeros((num_classes_2 * 4,), jnp.float32)
    return (wc1, bc1, wb1, bb1, wc2, bc2, wb2, bb2)


def _reference(x, params):
    """Pure-JAX reference mirroring the torch forward."""
    wc1, bc1, wb1, bb1, wc2, bc2, wb2, bb2 = params
    x2d = x.reshape(x.shape[0], -1)
    scores = (x2d @ wc1 + bc1) @ wc2 + bc2
    bbox_deltas = (x2d @ wb1 + bb1) @ wb2 + bb2
    return scores, bbox_deltas


if __name__ == "__main__":
    key = jax.random.PRNGKey(0)
    k_x, k_p = jax.random.split(key)

    batch, in_channels = 2, 32
    num_classes_1, num_classes_2 = 16, 8

    # Input as in torchvision box-head usage: (N, C, 1, 1).
    x = jax.random.normal(k_x, (batch, in_channels, 1, 1), jnp.float32)
    params = init_params(k_p, in_channels, num_classes_1, num_classes_2)

    scores, bbox_deltas = two_layered_fast_rcnn_predictor(x, params)
    scores, bbox_deltas = jax.block_until_ready((scores, bbox_deltas))

    ref_scores, ref_bbox = _reference(x, params)
    assert scores.shape == (batch, num_classes_2)
    assert bbox_deltas.shape == (batch, num_classes_2 * 4)
    assert jnp.allclose(scores, ref_scores, atol=1e-5, rtol=1e-5)
    assert jnp.allclose(bbox_deltas, ref_bbox, atol=1e-5, rtol=1e-5)

    print("KERNEL_OK")
</pallas_src>

<mosaic_0001>
module attributes {stable_mosaic.version = 11 : i64} {
  func.func @_predictor_kernel(%arg0: i32, %arg1: memref<8x128xf32, #tpu.memory_space<vmem>>, %arg2: memref<128x128xf32, #tpu.memory_space<vmem>>, %arg3: memref<1x128xf32, #tpu.memory_space<vmem>>, %arg4: memref<128x128xf32, #tpu.memory_space<vmem>>, %arg5: memref<1x128xf32, #tpu.memory_space<vmem>>, %arg6: memref<8x128xf32, #tpu.memory_space<vmem>>) attributes {dimension_semantics = [#tpu.dimension_semantics<parallel>], iteration_bounds = array<i64: 1>, scalar_prefetch = 0 : i64, scratch_operands = 0 : i64, tpu.core_type = #tpu.core_type<tc>, window_params = [{transform_indices = @transform_0, window_bounds = array<i64: 8, 128>}, {pipeline_mode = #tpu.pipeline_mode<synchronous>, transform_indices = @transform_1, window_bounds = array<i64: 128, 128>}, {pipeline_mode = #tpu.pipeline_mode<synchronous>, transform_indices = @transform_2, window_bounds = array<i64: 1, 128>}, {pipeline_mode = #tpu.pipeline_mode<synchronous>, transform_indices = @transform_3, window_bounds = array<i64: 128, 128>}, {pipeline_mode = #tpu.pipeline_mode<synchronous>, transform_indices = @transform_4, window_bounds = array<i64: 1, 128>}, {transform_indices = @transform_5, window_bounds = array<i64: 8, 128>}]} {
    %c0 = arith.constant 0 : index
    %c0_0 = arith.constant 0 : index
    %0 = vector.load %arg1[%c0, %c0_0] : memref<8x128xf32, #tpu.memory_space<vmem>>, vector<8x128xf32>
    %c0_1 = arith.constant 0 : index
    %c0_2 = arith.constant 0 : index
    %1 = vector.load %arg2[%c0_1, %c0_2] : memref<128x128xf32, #tpu.memory_space<vmem>>, vector<128x128xf32>
    %cst = arith.constant dense<0.000000e+00> : vector<8x128xf32>
    %2 = tpu.matmul %0, %1, %cst {dimension_numbers = #tpu.dot_dimension_numbers<[1], [0], [0], [1], [0, 0, 1, 1], [], []>} : vector<8x128xf32>, vector<128x128xf32>, vector<8x128xf32> -> vector<8x128xf32>
    %c0_3 = arith.constant 0 : index
    %c0_4 = arith.constant 0 : index
    %3 = vector.load %arg3[%c0_3, %c0_4] : memref<1x128xf32, #tpu.memory_space<vmem>>, vector<1x128xf32>
    %4 = vector.broadcast %3 : vector<1x128xf32> to vector<8x128xf32>
    %5 = arith.addf %2, %4 : vector<8x128xf32>
    %c0_5 = arith.constant 0 : index
    %c0_6 = arith.constant 0 : index
    %6 = vector.load %arg4[%c0_5, %c0_6] : memref<128x128xf32, #tpu.memory_space<vmem>>, vector<128x128xf32>
    %cst_7 = arith.constant dense<0.000000e+00> : vector<8x128xf32>
    %7 = tpu.matmul %5, %6, %cst_7 {dimension_numbers = #tpu.dot_dimension_numbers<[1], [0], [0], [1], [0, 0, 1, 1], [], []>} : vector<8x128xf32>, vector<128x128xf32>, vector<8x128xf32> -> vector<8x128xf32>
    %c0_8 = arith.constant 0 : index
    %c0_9 = arith.constant 0 : index
    %8 = vector.load %arg5[%c0_8, %c0_9] : memref<1x128xf32, #tpu.memory_space<vmem>>, vector<1x128xf32>
    %9 = vector.broadcast %8 : vector<1x128xf32> to vector<8x128xf32>
    %10 = arith.addf %7, %9 : vector<8x128xf32>
    %c0_10 = arith.constant 0 : index
    %c0_11 = arith.constant 0 : index
    %11 = vector.load %arg6[%c0_10, %c0_11] : memref<8x128xf32, #tpu.memory_space<vmem>>, vector<8x128xf32>
    tpu.vector_store %arg6[%c0_10, %c0_11], %10 {strides = array<i32>} : memref<8x128xf32, #tpu.memory_space<vmem>>, vector<8x128xf32>,
    return
  }
  func.func @transform_0(%arg0: i32) -> (i32, i32) {
    %c0_i32 = arith.constant 0 : i32
    %c0_i32_0 = arith.constant 0 : i32
    return %arg0, %c0_i32 : i32, i32
  }
  func.func @transform_1(%arg0: i32) -> (i32, i32) {
    %c0_i32 = arith.constant 0 : i32
    %c0_i32_0 = arith.constant 0 : i32
    %c0_i32_1 = arith.constant 0 : i32
    return %c0_i32, %c0_i32_0 : i32, i32
  }
  func.func @transform_2(%arg0: i32) -> (i32, i32) {
    %c0_i32 = arith.constant 0 : i32
    %c0_i32_0 = arith.constant 0 : i32
    %c0_i32_1 = arith.constant 0 : i32
    return %c0_i32, %c0_i32_0 : i32, i32
  }
  func.func @transform_3(%arg0: i32) -> (i32, i32) {
    %c0_i32 = arith.constant 0 : i32
    %c0_i32_0 = arith.constant 0 : i32
    %c0_i32_1 = arith.constant 0 : i32
    return %c0_i32, %c0_i32_0 : i32, i32
  }
  func.func @transform_4(%arg0: i32) -> (i32, i32) {
    %c0_i32 = arith.constant 0 : i32
    %c0_i32_0 = arith.constant 0 : i32
    %c0_i32_1 = arith.constant 0 : i32
    return %c0_i32, %c0_i32_0 : i32, i32
  }
  func.func @transform_5(%arg0: i32) -> (i32, i32) {
    %c0_i32 = arith.constant 0 : i32
    %c0_i32_0 = arith.constant 0 : i32
    return %arg0, %c0_i32 : i32, i32
  }
}

</mosaic_0001>

<bundles_post_ra>
// kernel: two_layered_fast_rcnn_predictor.1
= control target key start
LH: loop header
LB: loop body
LE: loop exit
PB: predicated region body
PF: predicated region fallthrough
CT: control target
= control target key end

     0   :  { %v369_v0 = vmov 0.0|0.0   ;;  %vm370_vm0 = vmmov 0   ;;  %v371_v4 = vmov 0.0   ;;  %s526_s1 = inlined_call_operand.vmem [shape: f32[128,128], index: 1, kind: input, shape index: {}]   ;;  %s527_s3 = inlined_call_operand.vmem [shape: f32[128,128], index: 3, kind: input, shape index: {}]   ;;  %s528_s0 = inlined_call_operand.vmem [shape: f32[8,128], index: 0, kind: input, shape index: {}]   ;;  %s529_s2 = inlined_call_operand.vmem [shape: f32[1,128], index: 2, kind: input, shape index: {}]   ;;  %s530_s4 = inlined_call_operand.vmem [shape: f32[1,128], index: 4, kind: input, shape index: {}]   ;;  %s531_s5 = inlined_call_operand.vmem [shape: f32[8,128], index: 5, kind: output, shape index: {}]  }
   0x1   :  { %318 = vmatprep.subr.bf16.mxu0 %v369_v0  ;;  %v21_v1 = vld [vmem:[%s526_s1] sm:$0xff]  ;;  %v22_v2 = vld [vmem:[%s526_s1 + $0x8] sm:$0xff]  ;;  %v23_v3 = vld [vmem:[%s526_s1 + $0x10] sm:$0xff]  ;;  %280 = vmatprep.mubr.msk.f32.mxu0 %vm370_vm0, %v371_v4 }
   0x2   :  { %v319_v5 = vpack.c.bf16 %v22_v2, %v21_v1  ;;  %v24_v6 = vld [vmem:[%s526_s1 + $0x18] sm:$0xff]  ;;  %342 = vmatprep.subr.bf16.mxu1 %v369_v0  ;;  %315 = vmatprep.mubr.msk.f32.mxu1 %vm370_vm0, %v371_v4  ;;  %v25_v8 = vld [vmem:[%s526_s1 + $0x20] sm:$0xff]  ;;  %v26_v9 = vld [vmem:[%s526_s1 + $0x28] sm:$0xff] }
   0x3   :  { %v322_v7 = vpack.c.bf16 %v24_v6, %v23_v3  ;;  %v114_v10 = vld [vmem:[%s527_s3] sm:$0xff]  ;;  %v115_v11 = vld [vmem:[%s527_s3 + $0x8] sm:$0xff]  ;;  %v116_v12 = vld [vmem:[%s527_s3 + $0x10] sm:$0xff]  ;;  %v325_v14 = vpack.c.bf16 %v26_v9, %v25_v8 }
   0x4   :  { %320 = vmatpush3.bf16.msra.mxu0 %v319_v5  ;;  %v117_v13 = vld [vmem:[%s527_s3 + $0x18] sm:$0xff]  ;;  %v343_v15 = vpack.c.bf16 %v115_v11, %v114_v10  ;;  %v27_v16 = vld [vmem:[%s526_s1 + $0x30] sm:$0xff]  ;;  %v118_v19 = vld [vmem:[%s527_s3 + $0x20] sm:$0xff] }
   0x5   :  { %321 = vmatprep.subr.bf16.mxu0 %v369_v0  ;;  %v28_v17 = vld [vmem:[%s526_s1 + $0x38] sm:$0xff]  ;;  %v346_v18 = vpack.c.bf16 %v117_v13, %v116_v12  ;;  %v119_v20 = vld [vmem:[%s527_s3 + $0x28] sm:$0xff]  ;;  %v29_v22 = vld [vmem:[%s526_s1 + $0x40] sm:$0xff] }
   0x6   :  { %344 = vmatpush3.bf16.msra.mxu1 %v343_v15  ;;  %v328_v21 = vpack.c.bf16 %v28_v17, %v27_v16  ;;  %v30_v23 = vld [vmem:[%s526_s1 + $0x48] sm:$0xff]  ;;  %v349_v24 = vpack.c.bf16 %v119_v20, %v118_v19  ;;  %v120_v25 = vld [vmem:[%s527_s3 + $0x30] sm:$0xff]  ;;  %v121_v26 = vld [vmem:[%s527_s3 + $0x38] sm:$0xff] }
   0x7   :  { %345 = vmatprep.subr.bf16.mxu1 %v369_v0  ;;  %v331_v27 = vpack.c.bf16 %v30_v23, %v29_v22  ;;  %v31_v28 = vld [vmem:[%s526_s1 + $0x50] sm:$0xff]  ;;  %v32_v29 = vld [vmem:[%s526_s1 + $0x58] sm:$0xff]  ;;  %v352_v30 = vpack.c.bf16 %v121_v26, %v120_v25  ;;  %v122_v31 = vld [vmem:[%s527_s3 + $0x40] sm:$0xff] }
   0x8   :  { %323 = vmatpush3.bf16.msra.mxu0 %v322_v7  ;;  %v123_v32 = vld [vmem:[%s527_s3 + $0x48] sm:$0xff]  ;;  %v334_v33 = vpack.c.bf16 %v32_v29, %v31_v28  ;;  %v33_v34 = vld [vmem:[%s526_s1 + $0x60] sm:$0xff]  ;;  %v124_v37 = vld [vmem:[%s527_s3 + $0x50] sm:$0xff] }
   0x9   :  { %324 = vmatprep.subr.bf16.mxu0 %v369_v0  ;;  %v34_v35 = vld [vmem:[%s526_s1 + $0x68] sm:$0xff]  ;;  %v355_v36 = vpack.c.bf16 %v123_v32, %v122_v31  ;;  %v125_v38 = vld [vmem:[%s527_s3 + $0x58] sm:$0xff]  ;;  %v35_v40 = vld [vmem:[%s526_s1 + $0x70] sm:$0xff] }
   0xa   :  { %347 = vmatpush3.bf16.msra.mxu1 %v346_v18  ;;  %v337_v39 = vpack.c.bf16 %v34_v35, %v33_v34  ;;  %v36_v41 = vld [vmem:[%s526_s1 + $0x78] sm:$0xff]  ;;  %v358_v42 = vpack.c.bf16 %v125_v38, %v124_v37  ;;  %v126_v43 = vld [vmem:[%s527_s3 + $0x60] sm:$0xff]  ;;  %v127_v44 = vld [vmem:[%s527_s3 + $0x68] sm:$0xff] }
   0xb   :  { %348 = vmatprep.subr.bf16.mxu1 %v369_v0  ;;  %v340_v45 = vpack.c.bf16 %v36_v41, %v35_v40  ;;  %v361_v46 = vpack.c.bf16 %v127_v44, %v126_v43  ;;  %v20_v47 = vld [vmem:[%s528_s0] sm:$0xff]  ;;  %v128_v48 = vld [vmem:[%s527_s3 + $0x70] sm:$0xff]  ;;  %v129_v49 = vld [vmem:[%s527_s3 + $0x78] sm:$0xff] }
   0xc   :  { %326 = vmatpush3.bf16.msra.mxu0 %v325_v14  ;;  %v364_v50 = vpack.c.bf16 %v129_v49, %v128_v48  ;;  %v212_v51 = vld [vmem:[%s529_s2] ss:$0 sm:$0xff] }
   0xd   :  { %327 = vmatprep.subr.bf16.mxu0 %v369_v0  ;;  %v213_v55 = vld [vmem:[%s530_s4] ss:$0 sm:$0xff] }
   0xe   :  { %350 = vmatpush3.bf16.msra.mxu1 %v349_v24 }
   0xf   :  { %351 = vmatprep.subr.bf16.mxu1 %v369_v0 }
  0x10   :  { %329 = vmatpush3.bf16.msra.mxu0 %v328_v21 }
  0x11   :  { %330 = vmatprep.subr.bf16.mxu0 %v369_v0 }
  0x12   :  { %353 = vmatpush3.bf16.msra.mxu1 %v352_v30 }
  0x13   :  { %354 = vmatprep.subr.bf16.mxu1 %v369_v0 }
  0x14   :  { %332 = vmatpush3.bf16.msra.mxu0 %v331_v27 }
  0x15   :  { %333 = vmatprep.subr.bf16.mxu0 %v369_v0 }
  0x16   :  { %356 = vmatpush3.bf16.msra.mxu1 %v355_v36 }
  0x17   :  { %357 = vmatprep.subr.bf16.mxu1 %v369_v0 }
  0x18   :  { %335 = vmatpush3.bf16.msra.mxu0 %v334_v33 }
  0x19   :  { %336 = vmatprep.subr.bf16.mxu0 %v369_v0 }
  0x1a   :  { %359 = vmatpush3.bf16.msra.mxu1 %v358_v42 }
  0x1b   :  { %360 = vmatprep.subr.bf16.mxu1 %v369_v0 }
  0x1c   :  { %338 = vmatpush3.bf16.msra.mxu0 %v337_v39 }
  0x1d   :  { %339 = vmatprep.subr.bf16.mxu0 %v369_v0 }
  0x1e   :  { %362 = vmatpush3.bf16.msra.mxu1 %v361_v46 }
  0x1f   :  { %363 = vmatprep.subr.bf16.mxu1 %v369_v0 }
  0x20   :  { %341 = vmatpush3.bf16.msra.mxu0 %v340_v45 }
  0x22   :  { %365 = vmatpush3.bf16.msra.mxu1 %v364_v50 }
  0x23   :  { %281 = vmatmul.mubr.f32.vlgmr.msra.gmra.mrb[0].mxu0 %v20_v47 }
  0xf6   :  { %v110_v52 = vpop.f32.mrb[0].mxu0 }
  0xf7   :  { %v111_v53 = vadd.f32 %v212_v51, %v110_v52  ;;  %v282_v54 = vpop.f32.mrb[1].mxu0 }
  0xf9   :  { %316 = vmatmul.mubr.f32.vlgmr.msra.gmra.mrb[0].mxu1 %v111_v53 }
 0x1cc   :  { %v203_v56 = vpop.f32.mrb[0].mxu1 }
 0x1cd   :  { %v204_v57 = vadd.f32 %v213_v55, %v203_v56  ;;  %v317_v58 = vpop.f32.mrb[1].mxu1 }
 0x1cf   :  { %207 = vst [vmem:[%s531_s5] sm:$0xff] %v204_v57 }

</bundles_post_ra>
